<compile_context>
chip_gen: v6e
topology: v6e:2x2x1
jax: 0.10.0
libtpu: 0.0.40
codegen_flags: <defaults>
</compile_context>

<pallas_src>
import jax
import jax.numpy as jnp
from jax.experimental import pallas as pl
from jax.experimental.pallas import tpu as pltpu


def _round_up(x, m):
    return (x + m - 1) // m * m


def _sublane_multiple(itemsize):
    # Native sublane tiling: 8 rows of 32-bit, 16 of 16-bit, 32 of 8-bit.
    return {1: 32, 2: 16, 4: 8}.get(int(itemsize), 8)


def _vmem_capacity_bytes():
    try:
        return int(pltpu.get_tpu_info().vmem_capacity_bytes)
    except Exception:
        return 64 * 2 ** 20  # conservative fallback (v7x per-TensorCore VMEM)


# ------------------------------- kernels ------------------------------------

def _unembed_kernel(x_ref, w_ref, b_ref, o_ref):
    # x_ref: (tm, D)   residual tile   (compute dtype)
    # w_ref: (D, tn)   W_U vocab tile  (compute dtype)
    # b_ref: (1, tn)   b_U vocab tile  (f32)
    # o_ref: (tm, tn)  logits tile
    acc = jnp.dot(x_ref[...], w_ref[...], preferred_element_type=jnp.float32)
    o_ref[...] = (acc + b_ref[...]).astype(o_ref.dtype)


def _unembed_kernel_ktiled(x_ref, w_ref, b_ref, o_ref, acc_ref):
    # Same contraction, but d_model is tiled along grid axis 2 with an f32
    # accumulator held in VMEM scratch (init/finalize via pl.when).
    k = pl.program_id(2)

    @pl.when(k == 0)
    def _():
        acc_ref[...] = jnp.zeros_like(acc_ref)

    acc_ref[...] += jnp.dot(x_ref[...], w_ref[...],
                            preferred_element_type=jnp.float32)

    @pl.when(k == pl.num_programs(2) - 1)
    def _():
        o_ref[...] = (acc_ref[...] + b_ref[...]).astype(o_ref.dtype)


# ------------------------------- wrapper ------------------------------------

class PallasUnembed:
    """Unembed module. Casts + pads (W_U, b_U) once at construction and caches
    the result, so repeated calls (the normal transformer path) never re-stream
    W_U in f32 just to cast it before the kernel."""

    def __init__(self, w_u, b_u, *, compute_dtype=jnp.bfloat16, out_dtype=None,
                 tn=None, tk=None, tm_max=512):
        D, V = w_u.shape
        assert b_u.shape == (V,), "b_U must have shape (d_vocab,)"
        self.D, self.V = int(D), int(V)
        self.compute_dtype = (jnp.dtype(compute_dtype)
                              if compute_dtype is not None
                              else jnp.dtype(w_u.dtype))
        self.out_dtype = jnp.dtype(out_dtype) if out_dtype is not None else None
        self.tm_max = int(tm_max)

        cap = _vmem_capacity_bytes()
        # Tiles sized against ~70% of physical VMEM; scoped limit at ~90%.
        self.budget = max(int(cap * 0.70), 24 * 2 ** 20)
        self.vmem_limit = max(int(cap * 0.90), 32 * 2 ** 20)

        in_isz = self.compute_dtype.itemsize
        if tn is None or tk is None:
            auto_tk, auto_tn = self._pick_tk_tn(in_isz)
            tk = auto_tk if tk is None else int(tk)
            tn = auto_tn if tn is None else int(tn)
        self.tk, self.tn = int(tk), int(tn)
        self.ktiled = self.tk < self.D

        self.D_pad = _round_up(self.D, self.tk) if self.ktiled else self.D
        self.V_pad = _round_up(self.V, self.tn)

        # --- one-time weight preparation (cast + pad), cached on the object ---
        w2d = w_u.astype(self.compute_dtype)
        b2d = b_u.reshape(1, self.V).astype(jnp.float32)
        pad_d, pad_v = self.D_pad - self.D, self.V_pad - self.V
        if pad_d or pad_v:
            w2d = jnp.pad(w2d, ((0, pad_d), (0, pad_v)))
        if pad_v:
            b2d = jnp.pad(b2d, ((0, 0), (0, pad_v)))
        self.w_prepared = w2d
        self.b_prepared = b2d

    # --- tile selection -------------------------------------------------

    def _pick_tk_tn(self, in_isz, tm_ref=256, out_isz=4):
        D, V = self.D, self.V
        tn_cap = _round_up(V, 128)
        tn_cands = sorted({min(c, tn_cap) for c in (4096, 2048, 1024, 512, 256, 128)},
                          reverse=True)

        def footprint(tk, tn):
            f = (2 * tm_ref * tk * in_isz      # x double-buffer
                 + 2 * tk * tn * in_isz        # W double-buffer
                 + 2 * tm_ref * tn * out_isz   # output double-buffer
                 + 2 * tn * 4)                 # bias double-buffer
            if tk < D:
                f += tm_ref * tn * 4           # f32 accumulator scratch
            return f

        # Prefer keeping the full d_model in one block (no K grid axis).
        for tn in tn_cands:
            if footprint(D, tn) <= self.budget:
                return D, tn
        # Otherwise tile d_model (multiples of 128) until it fits.
        tk_cands = [c for c in (4096, 2048, 1024, 512, 256, 128) if c < D]
        for tn in tn_cands:
            for tk in tk_cands:
                if footprint(tk, tn) <= self.budget:
                    return tk, tn
        return 128, 128  # last resort

    def _pick_tm(self, M, out_isz):
        in_isz = self.compute_dtype.itemsize
        sm = max(_sublane_multiple(in_isz), _sublane_multiple(out_isz))
        m_pad_min = _round_up(M, sm)

        fixed = 2 * self.tk * self.tn * in_isz + 2 * self.tn * 4
        per_tm = 2 * self.tk * in_isz + 2 * self.tn * out_isz
        if self.ktiled:
            per_tm += self.tn * 4              # f32 accumulator scratch
        avail = max(self.budget - fixed, per_tm * sm)
        tm_fit = max((avail // per_tm) // sm * sm, sm)

        if m_pad_min <= tm_fit:
            # Whole flattened M in one tile: x block index is constant across
            # the entire grid, so x is DMA'd from HBM exactly once.
            return int(m_pad_min)
        tm = min(self.tm_max, int(tm_fit))
        return max(tm // sm * sm, sm)

    # --- forward ----------------------------------------------------------

    def __call__(self, x):
        B, S, D = x.shape
        assert D == self.D, "d_model mismatch with prepared W_U"
        out_dtype = (self.out_dtype if self.out_dtype is not None
                     else jnp.dtype(x.dtype))
        out_isz = out_dtype.itemsize

        M = B * S
        tm = self._pick_tm(M, out_isz)
        M_pad = _round_up(M, tm)
        n_m = M_pad // tm
        n_v = self.V_pad // self.tn
        n_k = self.D_pad // self.tk

        x2d = x.reshape(M, D).astype(self.compute_dtype)
        if M_pad != M or self.D_pad != D:
            x2d = jnp.pad(x2d, ((0, M_pad - M), (0, self.D_pad - D)))

        in_isz = self.compute_dtype.itemsize
        x_bytes = (M_pad * self.D_pad * in_isz) * (n_v if n_m > 1 else 1)
        bytes_accessed = int(x_bytes
                             + self.D_pad * self.V_pad * in_isz   # W streamed once
                             + n_m * self.V_pad * 4               # bias re-read per M tile
                             + M_pad * self.V_pad * out_isz)      # logits writeback
        cost = pl.CostEstimate(flops=int(2 * M_pad * self.D_pad * self.V_pad),
                               transcendentals=0,
                               bytes_accessed=bytes_accessed)

        out_shape = jax.ShapeDtypeStruct((M_pad, self.V_pad), out_dtype)

        if not self.ktiled:
            grid_spec = pltpu.PrefetchScalarGridSpec(
                num_scalar_prefetch=0,
                grid=(n_v, n_m),                                   # vocab outer, M inner
                in_specs=[
                    pl.BlockSpec((tm, self.D_pad), lambda j, i: (i, 0)),
                    pl.BlockSpec((self.D_pad, self.tn), lambda j, i: (0, j)),
                    pl.BlockSpec((1, self.tn), lambda j, i: (0, j)),
                ],
                out_specs=pl.BlockSpec((tm, self.tn), lambda j, i: (i, j)),
            )
            kernel = _unembed_kernel
            dims = ("parallel", "arbitrary")
        else:
            grid_spec = pltpu.PrefetchScalarGridSpec(
                num_scalar_prefetch=0,
                grid=(n_v, n_m, n_k),                              # K (reduction) innermost
                in_specs=[
                    pl.BlockSpec((tm, self.tk), lambda j, i, k: (i, k)),
                    pl.BlockSpec((self.tk, self.tn), lambda j, i, k: (k, j)),
                    pl.BlockSpec((1, self.tn), lambda j, i, k: (0, j)),
                ],
                out_specs=pl.BlockSpec((tm, self.tn), lambda j, i, k: (i, j)),
                scratch_shapes=[pltpu.VMEM((tm, self.tn), jnp.float32)],
            )
            kernel = _unembed_kernel_ktiled
            dims = ("parallel", "arbitrary", "arbitrary")

        out2d = pl.pallas_call(
            kernel,
            out_shape=out_shape,
            grid_spec=grid_spec,
            compiler_params=pltpu.CompilerParams(
                # Only the vocab axis is "parallel": on v7x's 2 TensorCores the
                # core split shards W_U (each core reads a disjoint slice)
                # instead of duplicating the full W_U stream per core.
                dimension_semantics=dims,
                vmem_limit_bytes=self.vmem_limit,
            ),
            cost_estimate=cost,
        )(x2d, self.w_prepared, self.b_prepared)

        return out2d[:M, :self.V].reshape(B, S, self.V)


def unembed(x, w_u, b_u, **kwargs):
    """One-shot convenience wrapper. For repeated calls, build PallasUnembed
    once so the cast/padded W_U copy is cached across calls."""
    return PallasUnembed(w_u, b_u, **kwargs)(x)


if __name__ == "__main__":
    # Small config consistent with the module: cfg.d_model, cfg.d_vocab, cfg.init_range
    batch, posn, d_model, d_vocab = 2, 8, 32, 256
    init_range = 0.02

    key = jax.random.PRNGKey(0)
    kx, kw, kx2, kw2 = jax.random.split(key, 4)

    x = jax.random.normal(kx, (batch, posn, d_model), dtype=jnp.float32)
    # nn.init.normal_(W_U, std=init_range)
    w_u = init_range * jax.random.normal(kw, (d_model, d_vocab), dtype=jnp.float32)
    # b_U = zeros(d_vocab)
    b_u = jnp.zeros((d_vocab,), dtype=jnp.float32)

    # 1) Default path: bf16 compute / f32 accumulate, weights cast+padded once.
    mod = PallasUnembed(w_u, b_u)
    out = mod(x)
    jax.block_until_ready(out)
    assert out.shape == (batch, posn, d_vocab)
    ref_bf16 = jnp.einsum(
        "bpd,dv->bpv",
        x.astype(jnp.bfloat16).astype(jnp.float32),
        w_u.astype(jnp.bfloat16).astype(jnp.float32)) + b_u
    assert jnp.allclose(out, ref_bf16, atol=2e-3, rtol=2e-3)

    # Second call reuses the cached (cast + padded) weights.
    out_again = mod(x)
    jax.block_until_ready(out_again)
    assert jnp.allclose(out_again, out)

    # 2) Exact-f32 path (matches the PyTorch semantics).
    out_f32 = unembed(x, w_u, b_u, compute_dtype=None)
    jax.block_until_ready(out_f32)
    ref_f32 = jnp.einsum("bpd,dv->bpv", x, w_u) + b_u
    assert jnp.allclose(out_f32, ref_f32, atol=1e-5, rtol=1e-5)

    # 3) Exercise the K-tiled (d_model-tiled) accumulator path + ragged vocab pad.
    d_model2, d_vocab2 = 256, 300
    x2 = jax.random.normal(kx2, (batch, posn, d_model2), dtype=jnp.float32)
    w2 = init_range * jax.random.normal(kw2, (d_model2, d_vocab2), dtype=jnp.float32)
    b2 = jnp.zeros((d_vocab2,), dtype=jnp.float32)
    out_k = unembed(x2, w2, b2, compute_dtype=None, tk=128, tn=128)
    jax.block_until_ready(out_k)
    ref_k = jnp.einsum("bpd,dv->bpv", x2, w2) + b2
    assert jnp.allclose(out_k, ref_k, atol=1e-5, rtol=1e-5)

    print("KERNEL_OK")
</pallas_src>

<mosaic_0001>
module attributes {stable_mosaic.version = 11 : i64} {
  func.func @_unembed_kernel(%arg0: i32, %arg1: i32, %arg2: memref<16x32xbf16, #tpu.memory_space<vmem>>, %arg3: memref<32x256xbf16, #tpu.memory_space<vmem>>, %arg4: memref<1x256xf32, #tpu.memory_space<vmem>>, %arg5: memref<16x256xf32, #tpu.memory_space<vmem>>) attributes {dimension_semantics = [#tpu.dimension_semantics<parallel>, #tpu.dimension_semantics<arbitrary>], iteration_bounds = array<i64: 1, 1>, scalar_prefetch = 0 : i64, scratch_operands = 0 : i64, tpu.core_type = #tpu.core_type<tc>, window_params = [{transform_indices = @transform_0, window_bounds = array<i64: 16, 32>}, {transform_indices = @transform_1, window_bounds = array<i64: 32, 256>}, {transform_indices = @transform_2, window_bounds = array<i64: 1, 256>}, {transform_indices = @transform_3, window_bounds = array<i64: 16, 256>}]} {
    %c0 = arith.constant 0 : index
    %c0_0 = arith.constant 0 : index
    %0 = vector.load %arg2[%c0, %c0_0] : memref<16x32xbf16, #tpu.memory_space<vmem>>, vector<16x32xbf16>
    %c0_1 = arith.constant 0 : index
    %c0_2 = arith.constant 0 : index
    %1 = vector.load %arg3[%c0_1, %c0_2] : memref<32x256xbf16, #tpu.memory_space<vmem>>, vector<32x256xbf16>
    %cst = arith.constant dense<0.000000e+00> : vector<16x256xf32>
    %2 = tpu.matmul %0, %1, %cst {dimension_numbers = #tpu.dot_dimension_numbers<[1], [0], [0], [1], [0, 0, 1, 1], [], []>} : vector<16x32xbf16>, vector<32x256xbf16>, vector<16x256xf32> -> vector<16x256xf32>
    %c0_3 = arith.constant 0 : index
    %c0_4 = arith.constant 0 : index
    %3 = vector.load %arg4[%c0_3, %c0_4] : memref<1x256xf32, #tpu.memory_space<vmem>>, vector<1x256xf32>
    %4 = vector.broadcast %3 : vector<1x256xf32> to vector<16x256xf32>
    %5 = arith.addf %2, %4 : vector<16x256xf32>
    %c0_5 = arith.constant 0 : index
    %c0_6 = arith.constant 0 : index
    %6 = vector.load %arg5[%c0_5, %c0_6] : memref<16x256xf32, #tpu.memory_space<vmem>>, vector<16x256xf32>
    tpu.vector_store %arg5[%c0_5, %c0_6], %5 {strides = array<i32>} : memref<16x256xf32, #tpu.memory_space<vmem>>, vector<16x256xf32>,
    return
  }
  func.func @transform_0(%arg0: i32, %arg1: i32) -> (i32, i32) {
    %c0_i32 = arith.constant 0 : i32
    %c0_i32_0 = arith.constant 0 : i32
    return %arg1, %c0_i32 : i32, i32
  }
  func.func @transform_1(%arg0: i32, %arg1: i32) -> (i32, i32) {
    %c0_i32 = arith.constant 0 : i32
    %c0_i32_0 = arith.constant 0 : i32
    return %c0_i32, %arg0 : i32, i32
  }
  func.func @transform_2(%arg0: i32, %arg1: i32) -> (i32, i32) {
    %c0_i32 = arith.constant 0 : i32
    %c0_i32_0 = arith.constant 0 : i32
    return %c0_i32, %arg0 : i32, i32
  }
  func.func @transform_3(%arg0: i32, %arg1: i32) -> (i32, i32) {
    %c0_i32 = arith.constant 0 : i32
    return %arg1, %arg0 : i32, i32
  }
}

</mosaic_0001>

<bundles_post_ra>
// kernel: tpu_custom_call.1
= control target key start
LH: loop header
LB: loop body
LE: loop exit
PB: predicated region body
PF: predicated region fallthrough
CT: control target
= control target key end

     0   :  { %8 = vsyncpa [#allocation3], 0  ;;  %s287_s0 = inlined_call_operand.hbm [shape: bf16[16,32], index: 0, kind: input, shape index: {}]   ;;  %s288_s1 = inlined_call_operand.hbm [shape: bf16[32,256], index: 1, kind: input, shape index: {}]   ;;  %s289_s2 = inlined_call_operand.vmem [shape: f32[1,256], index: 2, kind: input, shape index: {}]   ;;  %s290_s3 = inlined_call_operand.hbm [shape: f32[16,256], index: 3, kind: output, shape index: {}]  }
   0x1   :  { %9 = vsyncpa [#allocation6], 0 }
   0x2   :  { %10 = vsyncpa [#allocation4], 0  ;;  %s245_s12 = smov [#allocation2]  }
   0x3   :  { %s16_s13 = sshll.u32 %s245_s12, 4  ;;  %s17_s13 = int_to_ptr.vmem [resolvable:$true] %s16_s13 }
   0x4   :  { %s187_s14 = scalar_lea.vmem %s17_s13, 128  ;;  %p192_p1 = scmp.lt.s32.totalorder %s17_s13, %s17_s13 }
   0x5   :  { %p188_p0 = scmp.ne.s32.totalorder %s17_s13, %s187_s14  ;;  %p193_p2 = scmp.lt.s32.totalorder %s187_s14, %s187_s14 }
   0x7   :  { %p194_p3 = por %p193_p2, %p192_p1 }
   0x9   :  { %p195_p4 = pnand %p194_p3, %p188_p0 }
   0xb   :  { %198 = shalt.err (!%p195_p4)
}
   0xc   :  { %s246_s15 = smov 64   ;;  %s247_s16 = smov 4  }
   0xd   :  { %22 = dma.hbm_to_vmem [thread:$0]  %s287_s0, 128, %s17_s13, [#allocation3], %s246_s15, %s246_s15, %s247_s16  }
   0xe   :  { %s248_s19 = smov [#allocation5]  }
   0xf   :  { %s28_s20 = sshll.u32 %s248_s19, 4  ;;  %s29_s20 = int_to_ptr.vmem [resolvable:$true] %s28_s20 }
  0x10   :  { %s207_s21 = scalar_lea.vmem %s29_s20, 512  ;;  %p212_p6 = scmp.lt.s32.totalorder %s29_s20, %s29_s20 }
  0x11   :  { %p208_p5 = scmp.ne.s32.totalorder %s29_s20, %s207_s21  ;;  %p213_p7 = scmp.lt.s32.totalorder %s207_s21, %s207_s21 }
  0x13   :  { %p214_p8 = por %p213_p7, %p212_p6 }
  0x15   :  { %p215_p9 = pnand %p214_p8, %p208_p5 }
  0x17   :  { %218 = shalt.err (!%p215_p9)
}
  0x18   :  { %s249_s22 = smov 128   ;;  %s250_s23 = smov 8  }
  0x19   :  { %34 = dma.hbm_to_vmem [thread:$0]  %s288_s1, 512, %s29_s20, [#allocation6], %s249_s22, %s249_s22, %s250_s23  }
  0x1a   :  { %239 = dma.done.wait [#allocation3], 128  }
  0x1b   :  { %240 = vsyncadd [#allocation3], 4294967168 }
  0x1c   :  { %241 = dma.done.wait [#allocation6], 512  }
  0x1d   :  { %242 = vsyncadd [#allocation6], 4294966784  ;;  %v251_v0 = vmov 0   ;;  %v172_v1 = vld [vmem:[#allocation5 + $0x14] ss:$8 sps:$4 sm:$0xff]   ;;  %vm87_vm0 = vcmask 261120   ;;  %v52_v6 = vlaneseq }
  0x1e   :  { %123 = vmatprep.mubr.bf16.mxu0 %v251_v0  ;;  %v174_v2 = vld [vmem:[#allocation5 + $0x10] ss:$8 sps:$4 sm:$0xff]   ;;  %103 = vmatprep.subr.bf16.mxu0 %v172_v1  ;;  %v175_v3 = vld [vmem:[#allocation5 + $0x4] ss:$8 sps:$4 sm:$0xff]   ;;  %v177_v4 = vld [vmem:[#allocation5] ss:$8 sps:$4 sm:$0xff]  }
  0x1f   :  { %104 = vmatpush1.bf16.msra.mxu0 %v174_v2  ;;  %v178_v5 = vld [vmem:[#allocation2] sm:$0xff]   ;;  %v53_v7 = vshrl.u32 %v52_v6, 7  ;;  %s252_s26 = smov [#allocation7]  }
  0x20   :  { %105 = vmatprep.subr.bf16.mxu0 %v175_v3  ;;  %v50_v9 = vld [vmem:[%s289_s2] sm:$0x3]  ;;  %s143_s27 = sshll.u32 %s252_s26, 4  ;;  %s144_s27 = int_to_ptr.vmem [resolvable:$true] %s143_s27 }
  0x21   :  { %v54_v8 = vsub.s32 0, %v53_v7  ;;  %v58_v10 = vsub.s32 1, %v53_v7  ;;  %s219_s28 = scalar_lea.vmem %s144_s27, 512  ;;  %p224_p11 = scmp.lt.s32.totalorder %s144_s27, %s144_s27 }
  0x22   :  { %p220_p10 = scmp.ne.s32.totalorder %s144_s27, %s219_s28  ;;  %p225_p12 = scmp.lt.s32.totalorder %s219_s28, %s219_s28 }
  0x23   :  { %106 = vmatpush1.bf16.msra.mxu0 %v177_v4  ;;  %v55_v11 = vrot.slane %v50_v9, %v54_v8  ;;  %v59_v12 = vrot.slane %v50_v9, %v58_v10 }
  0x24   :  { %p226_p13 = por %p225_p12, %p224_p11 }
  0x26   :  { %161 = vmatmul.mubr.msk.bf16.vlgmr.msra.gmra.mxu0 %vm87_vm0, %v178_v5  ;;  %p227_p0 = pnand %p226_p13, %p220_p10 }
  0xe6   :  { %v125_v13 = vpop.f32.mrf.mxu0 }
  0xe7   :  { %v126_v14 = vadd.f32 %v125_v13, %v55_v11 }
  0xe8   :  { %v127_v15 = vpop.f32.mrf.mxu0 }
  0xe9   :  { %134 = vst [vmem:[#allocation7] sm:$0xff] %v126_v14  ;;  %v128_v16 = vadd.f32 %v127_v15, %v59_v12 }
  0xea   :  { %v129_v17 = vpop.f32.mrf.mxu0 }
  0xeb   :  { %135 = vst [vmem:[#allocation7 + $0x8] sm:$0xff] %v128_v16  ;;  %v130_v18 = vadd.f32 %v129_v17, %v55_v11 }
  0xec   :  { %v131_v19 = vpop.f32.mrf.mxu0 }
  0xed   :  { %136 = vst [vmem:[#allocation7 + $0x10] sm:$0xff] %v130_v18  ;;  %v132_v20 = vadd.f32 %v131_v19, %v59_v12 }
  0xef   :  { %137 = vst [vmem:[#allocation7 + $0x18] sm:$0xff] %v132_v20 }
  0xf0   :  { %230 = shalt.err (!%p227_p0)
}
  0xf1   :  { %s253_s2 = smov 256   ;;  %s254_s29 = smov 16  }
  0xf2   :  { %149 = dma.vmem_to_hbm [thread:$0]  %s144_s27, 512, %s290_s3, [#allocation4], %s253_s2, %s253_s2, %s254_s29  }
  0xf3   :  { %243 = dma.done.wait [#allocation4], 512  }
  0xf4   :  { %244 = vsyncadd [#allocation4], 4294966784 }
  0xf5   :  { %153 = vsyncpa [#allocation3], 1 }
  0xf6   :  { %154 = vsyncpa [#allocation6], 1 }
  0xf7   :  { %155 = vsyncpa [#allocation4], 1 }

</bundles_post_ra>
